<compile_context>
chip_gen: v7x
topology: tpu7x:2x2x1
jax: 0.10.0
libtpu: 0.0.40
codegen_flags: <defaults>
</compile_context>

<pallas_src>
import jax
import jax.numpy as jnp
from jax.experimental import pallas as pl
from jax.experimental.pallas import tpu as pltpu


HEAD_PAD = 128  # lane-dense width of the fused (mean ++ std) head output


def _round_up(x, m):
    return (x + m - 1) // m * m


def _make_kernel(n_hidden):
    """Build a kernel for `n_hidden` hidden (linear+relu) layers + fused head."""

    def kernel(*refs):
        # refs = x, (w, b) * n_hidden, w_head, b_head, out
        x_ref = refs[0]
        out_ref = refs[-1]
        h = x_ref[...]
        for l in range(n_hidden):
            w = refs[1 + 2 * l][...]
            b = refs[2 + 2 * l][...]
            h = jnp.dot(h.astype(w.dtype), w,
                        preferred_element_type=jnp.float32) + b
            h = jnp.maximum(h, 0.0)
        wh = refs[1 + 2 * n_hidden][...]
        bh = refs[2 + 2 * n_hidden][...]
        out_ref[...] = (jnp.dot(h.astype(wh.dtype), wh,
                                preferred_element_type=jnp.float32)
                        + bh).astype(out_ref.dtype)

    return kernel


def spectral_encoder(x, params, *, compute_dtype=jnp.float32, batch_tile=512):
    """x: (B, spectral_bands) float32.  Returns (mean (B, ld//2), std (B, ld))."""
    B, SB = x.shape
    hidden = params["hidden"]                      # list of (w, b), transposed
    n_hidden = len(hidden)
    head_in = params["w_std"].shape[0]
    ld = params["w_std"].shape[1]
    ld_half = params["w_mean"].shape[1]
    n_head = ld_half + ld
    assert n_head <= HEAD_PAD, "fused head assumes ld + ld//2 <= 128"

    # --- fuse the two heads into one lane-dense (head_in, 128) weight/bias --
    wh = jnp.zeros((head_in, HEAD_PAD), jnp.float32)
    wh = wh.at[:, :ld_half].set(params["w_mean"])
    wh = wh.at[:, ld_half:n_head].set(params["w_std"])
    bh = jnp.zeros((1, HEAD_PAD), jnp.float32)
    bh = bh.at[:, :ld_half].set(params["b_mean"])
    bh = bh.at[:, ld_half:n_head].set(params["b_std"])

    # MXU operands in compute_dtype (bf16 on v6e/v7x for throughput);
    # biases stay f32 so bias-add / relu run as f32 VPU ops (v5e-friendly).
    hw = [(w.astype(compute_dtype), b.astype(jnp.float32)) for w, b in hidden]
    wh = wh.astype(compute_dtype)
    bh = bh.astype(jnp.float32)

    # --- adaptive batch tiling: minimal grid, minimal padding ---------------
    num_tiles = -(-B // batch_tile)                # ceil(B / batch_tile)
    tb = _round_up(-(-B // num_tiles), 8)          # tile is a multiple of 8
    Bp = num_tiles * tb
    xp = x.astype(compute_dtype)
    if Bp != B:
        xp = jnp.pad(xp, ((0, Bp - B), (0, 0)))
    grid = (num_tiles,)

    # --- build operand list + specs -----------------------------------------
    operands = [xp]
    in_specs = [pl.BlockSpec((tb, SB), lambda i: (i, 0))]      # x: tiled over batch
    flops_per_row = 0
    weight_bytes = 0
    itemsize = jnp.dtype(compute_dtype).itemsize
    for w, b in hw:
        fi, fo = w.shape
        operands += [w, b]
        in_specs += [pl.BlockSpec((fi, fo), lambda i: (0, 0)),  # weight: resident
                     pl.BlockSpec((1, fo), lambda i: (0, 0))]   # bias:   resident
        flops_per_row += 2 * fi * fo
        weight_bytes += fi * fo * itemsize + fo * 4
    operands += [wh, bh]
    in_specs += [pl.BlockSpec((head_in, HEAD_PAD), lambda i: (0, 0)),
                 pl.BlockSpec((1, HEAD_PAD), lambda i: (0, 0))]
    flops_per_row += 2 * head_in * HEAD_PAD
    weight_bytes += head_in * HEAD_PAD * itemsize + HEAD_PAD * 4

    cost = pl.CostEstimate(
        flops=Bp * flops_per_row,
        transcendentals=0,
        bytes_accessed=Bp * SB * itemsize + weight_bytes + Bp * HEAD_PAD * 4,
    )

    out_padded = pl.pallas_call(
        _make_kernel(n_hidden),
        out_shape=jax.ShapeDtypeStruct((Bp, HEAD_PAD), jnp.float32),
        grid=grid,
        in_specs=in_specs,
        out_specs=pl.BlockSpec((tb, HEAD_PAD), lambda i: (i, 0)),
        compiler_params=pltpu.CompilerParams(
            dimension_semantics=("parallel",)),                 # 2 TCs on v7x
        cost_estimate=cost,
    )(*operands)

    out = out_padded[:B]
    mean_vector = out[:, :ld_half]
    std_vector = out[:, ld_half:n_head]
    return mean_vector, std_vector


def init_params(key, spectral_bands, ld, layers=3):
    """Deterministic synthetic init mirroring nn.Linear shapes (stored transposed)."""
    ld_half = ld // 2

    def lin(k, fan_in, fan_out):
        kw, kb = jax.random.split(k)
        bound = 1.0 / jnp.sqrt(jnp.float32(fan_in))
        w = jax.random.uniform(kw, (fan_in, fan_out), jnp.float32, -bound, bound)
        b = jax.random.uniform(kb, (1, fan_out), jnp.float32, -bound, bound)
        return w, b

    keys = jax.random.split(key, max(layers, 1) + 2)
    hidden = []
    head_in = spectral_bands
    if layers >= 2:
        hidden.append(lin(keys[0], spectral_bands, ld))          # linear1
        for i in range(1, layers - 1):
            hidden.append(lin(keys[i], ld, ld))                  # linear{i+1}
        head_in = ld
    wm, bm = lin(keys[-2], head_in, ld_half)                     # mean_layer
    ws, bs = lin(keys[-1], head_in, ld)                          # std_layer
    return {"hidden": hidden,
            "w_mean": wm, "b_mean": bm,
            "w_std": ws, "b_std": bs}


def reference_forward(x, p):
    h = x
    for w, b in p["hidden"]:
        h = jnp.maximum(h @ w + b, 0.0)
    return h @ p["w_mean"] + p["b_mean"], h @ p["w_std"] + p["b_std"]


if __name__ == "__main__":
    spectral_bands = 16
    ld = 32  # multiple of 4

    key = jax.random.PRNGKey(0)
    kx, kp, kx2 = jax.random.split(key, 3)
    params = init_params(kp, spectral_bands, ld, layers=3)

    # --- small batch, f32 compute, tight tolerance (grid = 1) ---------------
    batch = 8
    x = jax.random.normal(kx, (batch, spectral_bands), jnp.float32)
    mean_vec, std_vec = spectral_encoder(x, params)
    mean_vec, std_vec = jax.block_until_ready((mean_vec, std_vec))

    mean_ref, std_ref = reference_forward(x, params)
    assert mean_vec.shape == (batch, ld // 2)
    assert std_vec.shape == (batch, ld)
    assert jnp.allclose(mean_vec, mean_ref, atol=1e-5)
    assert jnp.allclose(std_vec, std_ref, atol=1e-5)

    # --- larger, non-divisible batch exercising the adaptive batch grid
    #     (3 tiles of 352, only 16 padded rows) and the bf16 MXU path
    #     (f32 accumulation, looser tolerance) --------------------------------
    big_batch = 1040
    xb = jax.random.normal(kx2, (big_batch, spectral_bands), jnp.float32)
    mean_b, std_b = spectral_encoder(xb, params,
                                     compute_dtype=jnp.bfloat16,
                                     batch_tile=512)
    mean_b, std_b = jax.block_until_ready((mean_b, std_b))

    mean_rb, std_rb = reference_forward(xb, params)
    assert mean_b.shape == (big_batch, ld // 2)
    assert std_b.shape == (big_batch, ld)
    assert jnp.allclose(mean_b, mean_rb, atol=1e-1)
    assert jnp.allclose(std_b, std_rb, atol=1e-1)

    print("KERNEL_OK")
</pallas_src>

<mosaic_0001>
module attributes {stable_mosaic.version = 11 : i64} {
  func.func @kernel(%arg0: i32, %arg1: memref<8x16xf32, #tpu.memory_space<vmem>>, %arg2: memref<16x32xf32, #tpu.memory_space<vmem>>, %arg3: memref<1x32xf32, #tpu.memory_space<vmem>>, %arg4: memref<32x32xf32, #tpu.memory_space<vmem>>, %arg5: memref<1x32xf32, #tpu.memory_space<vmem>>, %arg6: memref<32x128xf32, #tpu.memory_space<vmem>>, %arg7: memref<1x128xf32, #tpu.memory_space<vmem>>, %arg8: memref<8x128xf32, #tpu.memory_space<vmem>>) attributes {dimension_semantics = [#tpu.dimension_semantics<parallel>], iteration_bounds = array<i64: 1>, scalar_prefetch = 0 : i64, scratch_operands = 0 : i64, tpu.core_type = #tpu.core_type<tc>, window_params = [{transform_indices = @transform_0, window_bounds = array<i64: 8, 16>}, {pipeline_mode = #tpu.pipeline_mode<synchronous>, transform_indices = @transform_1, window_bounds = array<i64: 16, 32>}, {pipeline_mode = #tpu.pipeline_mode<synchronous>, transform_indices = @transform_2, window_bounds = array<i64: 1, 32>}, {pipeline_mode = #tpu.pipeline_mode<synchronous>, transform_indices = @transform_3, window_bounds = array<i64: 32, 32>}, {pipeline_mode = #tpu.pipeline_mode<synchronous>, transform_indices = @transform_4, window_bounds = array<i64: 1, 32>}, {pipeline_mode = #tpu.pipeline_mode<synchronous>, transform_indices = @transform_5, window_bounds = array<i64: 32, 128>}, {pipeline_mode = #tpu.pipeline_mode<synchronous>, transform_indices = @transform_6, window_bounds = array<i64: 1, 128>}, {transform_indices = @transform_7, window_bounds = array<i64: 8, 128>}]} {
    %c0 = arith.constant 0 : index
    %c0_0 = arith.constant 0 : index
    %0 = vector.load %arg1[%c0, %c0_0] : memref<8x16xf32, #tpu.memory_space<vmem>>, vector<8x16xf32>
    %c0_1 = arith.constant 0 : index
    %c0_2 = arith.constant 0 : index
    %1 = vector.load %arg2[%c0_1, %c0_2] : memref<16x32xf32, #tpu.memory_space<vmem>>, vector<16x32xf32>
    %c0_3 = arith.constant 0 : index
    %c0_4 = arith.constant 0 : index
    %2 = vector.load %arg3[%c0_3, %c0_4] : memref<1x32xf32, #tpu.memory_space<vmem>>, vector<1x32xf32>
    %cst = arith.constant dense<0.000000e+00> : vector<8x32xf32>
    %3 = tpu.matmul %0, %1, %cst {dimension_numbers = #tpu.dot_dimension_numbers<[1], [0], [0], [1], [0, 0, 1, 1], [], []>} : vector<8x16xf32>, vector<16x32xf32>, vector<8x32xf32> -> vector<8x32xf32>
    %4 = vector.broadcast %2 : vector<1x32xf32> to vector<8x32xf32>
    %5 = arith.addf %3, %4 : vector<8x32xf32>
    %cst_5 = arith.constant 0.000000e+00 : f32
    %6 = vector.broadcast %cst_5 : f32 to vector<8x32xf32>
    %7 = arith.maximumf %5, %6 : vector<8x32xf32>
    %c0_6 = arith.constant 0 : index
    %c0_7 = arith.constant 0 : index
    %8 = vector.load %arg4[%c0_6, %c0_7] : memref<32x32xf32, #tpu.memory_space<vmem>>, vector<32x32xf32>
    %c0_8 = arith.constant 0 : index
    %c0_9 = arith.constant 0 : index
    %9 = vector.load %arg5[%c0_8, %c0_9] : memref<1x32xf32, #tpu.memory_space<vmem>>, vector<1x32xf32>
    %cst_10 = arith.constant dense<0.000000e+00> : vector<8x32xf32>
    %10 = tpu.matmul %7, %8, %cst_10 {dimension_numbers = #tpu.dot_dimension_numbers<[1], [0], [0], [1], [0, 0, 1, 1], [], []>} : vector<8x32xf32>, vector<32x32xf32>, vector<8x32xf32> -> vector<8x32xf32>
    %11 = vector.broadcast %9 : vector<1x32xf32> to vector<8x32xf32>
    %12 = arith.addf %10, %11 : vector<8x32xf32>
    %cst_11 = arith.constant 0.000000e+00 : f32
    %13 = vector.broadcast %cst_11 : f32 to vector<8x32xf32>
    %14 = arith.maximumf %12, %13 : vector<8x32xf32>
    %c0_12 = arith.constant 0 : index
    %c0_13 = arith.constant 0 : index
    %15 = vector.load %arg6[%c0_12, %c0_13] : memref<32x128xf32, #tpu.memory_space<vmem>>, vector<32x128xf32>
    %c0_14 = arith.constant 0 : index
    %c0_15 = arith.constant 0 : index
    %16 = vector.load %arg7[%c0_14, %c0_15] : memref<1x128xf32, #tpu.memory_space<vmem>>, vector<1x128xf32>
    %cst_16 = arith.constant dense<0.000000e+00> : vector<8x128xf32>
    %17 = tpu.matmul %14, %15, %cst_16 {dimension_numbers = #tpu.dot_dimension_numbers<[1], [0], [0], [1], [0, 0, 1, 1], [], []>} : vector<8x32xf32>, vector<32x128xf32>, vector<8x128xf32> -> vector<8x128xf32>
    %18 = vector.broadcast %16 : vector<1x128xf32> to vector<8x128xf32>
    %19 = arith.addf %17, %18 : vector<8x128xf32>
    %c0_17 = arith.constant 0 : index
    %c0_18 = arith.constant 0 : index
    %20 = vector.load %arg8[%c0_17, %c0_18] : memref<8x128xf32, #tpu.memory_space<vmem>>, vector<8x128xf32>
    tpu.vector_store %arg8[%c0_17, %c0_18], %19 {strides = array<i32>} : memref<8x128xf32, #tpu.memory_space<vmem>>, vector<8x128xf32>,
    return
  }
  func.func @transform_0(%arg0: i32) -> (i32, i32) {
    %c0_i32 = arith.constant 0 : i32
    %c0_i32_0 = arith.constant 0 : i32
    return %arg0, %c0_i32 : i32, i32
  }
  func.func @transform_1(%arg0: i32) -> (i32, i32) {
    %c0_i32 = arith.constant 0 : i32
    %c0_i32_0 = arith.constant 0 : i32
    %c0_i32_1 = arith.constant 0 : i32
    return %c0_i32, %c0_i32_0 : i32, i32
  }
  func.func @transform_2(%arg0: i32) -> (i32, i32) {
    %c0_i32 = arith.constant 0 : i32
    %c0_i32_0 = arith.constant 0 : i32
    %c0_i32_1 = arith.constant 0 : i32
    return %c0_i32, %c0_i32_0 : i32, i32
  }
  func.func @transform_3(%arg0: i32) -> (i32, i32) {
    %c0_i32 = arith.constant 0 : i32
    %c0_i32_0 = arith.constant 0 : i32
    %c0_i32_1 = arith.constant 0 : i32
    return %c0_i32, %c0_i32_0 : i32, i32
  }
  func.func @transform_4(%arg0: i32) -> (i32, i32) {
    %c0_i32 = arith.constant 0 : i32
    %c0_i32_0 = arith.constant 0 : i32
    %c0_i32_1 = arith.constant 0 : i32
    return %c0_i32, %c0_i32_0 : i32, i32
  }
  func.func @transform_5(%arg0: i32) -> (i32, i32) {
    %c0_i32 = arith.constant 0 : i32
    %c0_i32_0 = arith.constant 0 : i32
    %c0_i32_1 = arith.constant 0 : i32
    return %c0_i32, %c0_i32_0 : i32, i32
  }
  func.func @transform_6(%arg0: i32) -> (i32, i32) {
    %c0_i32 = arith.constant 0 : i32
    %c0_i32_0 = arith.constant 0 : i32
    %c0_i32_1 = arith.constant 0 : i32
    return %c0_i32, %c0_i32_0 : i32, i32
  }
  func.func @transform_7(%arg0: i32) -> (i32, i32) {
    %c0_i32 = arith.constant 0 : i32
    %c0_i32_0 = arith.constant 0 : i32
    return %arg0, %c0_i32 : i32, i32
  }
}

</mosaic_0001>

<bundles_post_ra>
// kernel: tpu_custom_call.1
= control target key start
LH: loop header
LB: loop body
LE: loop exit
PB: predicated region body
PF: predicated region fallthrough
CT: control target
= control target key end

     0   :  { %12 = vsyncpa [#allocation3], 0  ;;  %s675_s0 = inlined_call_operand.hbm [shape: f32[8,16], index: 0, kind: input, shape index: {}]   ;;  %s676_s1 = inlined_call_operand.hbm [shape: f32[16,32], index: 1, kind: input, shape index: {}]   ;;  %s677_s2 = inlined_call_operand.vmem [shape: f32[1,32], index: 2, kind: input, shape index: {}]   ;;  %s678_s3 = inlined_call_operand.hbm [shape: f32[32,32], index: 3, kind: input, shape index: {}]   ;;  %s679_s4 = inlined_call_operand.vmem [shape: f32[1,32], index: 4, kind: input, shape index: {}]   ;;  %s680_s5 = inlined_call_operand.hbm [shape: f32[32,128], index: 5, kind: input, shape index: {}]   ;;  %s681_s6 = inlined_call_operand.vmem [shape: f32[1,128], index: 6, kind: input, shape index: {}]   ;;  %s682_s7 = inlined_call_operand.hbm [shape: f32[8,128], index: 7, kind: output, shape index: {}]  }
   0x1   :  { %13 = vsyncpa [#allocation6], 0 }
   0x2   :  { %14 = vsyncpa [#allocation9], 0 }
   0x3   :  { %15 = vsyncpa [#allocation4], 0  ;;  %s544_s24 = smov [#allocation5]   ;;  %s426_s28 = scalar_lea.hbm %s676_s1, 256 }
   0x4   :  { %s31_s25 = sshll.u32 %s544_s24, 4  ;;  %p427_p0 = scmp.ne.s32.totalorder %s676_s1, %s426_s28  ;;  %s32_s25 = int_to_ptr.vmem [resolvable:$true] %s31_s25 }
   0x5   :  { %p430_p1 = scmp.lt.u32.totalorder %s426_s28, %s676_s1 }
   0x7   :  { %p432_p2 = pnand %p430_p1, %p427_p0 }
   0x9   :  { %435 = shalt.err (!%p432_p2)
}
   0xa   :  { %s436_s10 = scalar_lea.vmem %s32_s25, 256  ;;  %p441_p4 = scmp.lt.s32.totalorder %s32_s25, %s32_s25 }
   0xb   :  { %p437_p3 = scmp.ne.s32.totalorder %s32_s25, %s436_s10  ;;  %p442_p5 = scmp.lt.s32.totalorder %s436_s10, %s436_s10 }
   0xd   :  { %p443_p6 = por %p442_p5, %p441_p4 }
   0xf   :  { %p444_p7 = pnand %p443_p6, %p437_p3 }
  0x11   :  { %447 = shalt.err (!%p444_p7)
}
  0x12   :  { %s545_s11 = smov 128   ;;  %s546_s12 = smov 8  }
  0x13   :  { %37 = dma.hbm_to_vmem [thread:$0]  %s676_s1, 256, %s32_s25, [#allocation6], %s545_s11, %s545_s11, %s546_s12  }
  0x14   :  { %s547_s15 = smov [#allocation2]   ;;  %s548_s17 = smov [#allocation7]  }
  0x15   :  { %s22_s16 = sshll.u32 %s547_s15, 4  ;;  %s45_s18 = sshll.u32 %s548_s17, 4  ;;  %s23_s16 = int_to_ptr.vmem [resolvable:$true] %s22_s16  ;;  %s46_s18 = int_to_ptr.vmem [resolvable:$true] %s45_s18 }
  0x16   :  { %s448_s21 = scalar_lea.hbm %s675_s0, 128 }
  0x17   :  { %p449_p8 = scmp.ne.s32.totalorder %s675_s0, %s448_s21  ;;  %p452_p9 = scmp.lt.u32.totalorder %s448_s21, %s675_s0 }
  0x19   :  { %p454_p10 = pnand %p452_p9, %p449_p8 }
  0x1b   :  { %457 = shalt.err (!%p454_p10)
}
  0x1c   :  { %s458_s1 = scalar_lea.vmem %s23_s16, 128  ;;  %p463_p12 = scmp.lt.s32.totalorder %s23_s16, %s23_s16 }
  0x1d   :  { %p459_p11 = scmp.ne.s32.totalorder %s23_s16, %s458_s1  ;;  %p464_p13 = scmp.lt.s32.totalorder %s458_s1, %s458_s1 }
  0x1f   :  { %p465_p0 = por %p464_p13, %p463_p12 }
  0x21   :  { %p466_p1 = pnand %p465_p0, %p459_p11 }
  0x23   :  { %469 = shalt.err (!%p466_p1)
}
  0x24   :  { %25 = dma.hbm_to_vmem [thread:$0]  %s675_s0, 128, %s23_s16, [#allocation3]  }
  0x25   :  { %s470_s30 = scalar_lea.hbm %s678_s3, 512 }
  0x26   :  { %p471_p2 = scmp.ne.s32.totalorder %s678_s3, %s470_s30  ;;  %p474_p3 = scmp.lt.u32.totalorder %s470_s30, %s678_s3 }
  0x28   :  { %p476_p4 = pnand %p474_p3, %p471_p2 }
  0x2a   :  { %479 = shalt.err (!%p476_p4)
}
  0x2b   :  { %s480_s14 = scalar_lea.vmem %s46_s18, 512  ;;  %p485_p6 = scmp.lt.s32.totalorder %s46_s18, %s46_s18 }
  0x2c   :  { %p481_p5 = scmp.ne.s32.totalorder %s46_s18, %s480_s14  ;;  %p486_p7 = scmp.lt.s32.totalorder %s480_s14, %s480_s14 }
  0x2e   :  { %p487_p8 = por %p486_p7, %p485_p6 }
  0x30   :  { %p488_p9 = pnand %p487_p8, %p481_p5 }
  0x32   :  { %491 = shalt.err (!%p488_p9)
}
  0x33   :  { %51 = dma.hbm_to_vmem [thread:$0]  %s678_s3, 512, %s46_s18, [#allocation6], %s545_s11, %s545_s11, %s546_s12  }
  0x34   :  { %s549_s16 = smov [#allocation8]   ;;  %s492_s21 = scalar_lea.hbm %s680_s5, 512 }
  0x35   :  { %s59_s17 = sshll.u32 %s549_s16, 4  ;;  %p493_p10 = scmp.ne.s32.totalorder %s680_s5, %s492_s21  ;;  %s60_s17 = int_to_ptr.vmem [resolvable:$true] %s59_s17 }
  0x36   :  { %p496_p11 = scmp.lt.u32.totalorder %s492_s21, %s680_s5 }
  0x38   :  { %p498_p12 = pnand %p496_p11, %p493_p10 }
  0x3a   :  { %501 = shalt.err (!%p498_p12)
}
  0x3b   :  { %s502_s1 = scalar_lea.vmem %s60_s17, 512  ;;  %p507_p0 = scmp.lt.s32.totalorder %s60_s17, %s60_s17 }
  0x3c   :  { %p503_p13 = scmp.ne.s32.totalorder %s60_s17, %s502_s1  ;;  %p508_p1 = scmp.lt.s32.totalorder %s502_s1, %s502_s1 }
  0x3e   :  { %p509_p2 = por %p508_p1, %p507_p0 }
  0x40   :  { %p510_p3 = pnand %p509_p2, %p503_p13 }
  0x42   :  { %513 = shalt.err (!%p510_p3)
}
  0x43   :  { %65 = dma.hbm_to_vmem [thread:$0]  %s680_s5, 512, %s60_s17, [#allocation9], %s545_s11, %s545_s11, %s546_s12  }
  0x44   :  { %536 = dma.done.wait [#allocation3], 128  }
  0x45   :  { %537 = vsyncadd [#allocation3], 4294967168 }
  0x46   :  { %538 = dma.done.wait [#allocation6], 768  }
  0x47   :  { %539 = vsyncadd [#allocation6], 4294966528 }
  0x48   :  { %540 = dma.done.wait [#allocation9], 512  }
  0x49   :  { %541 = vsyncadd [#allocation9], 4294966784  ;;  %v550_v0 = vmov 0.0|0.0   ;;  %vm551_vm0 = vmmov 0   ;;  %v552_v1 = vmov 0.0   ;;  %v81_v2 = vld [vmem:[#allocation5] sm:$0xff] }
  0x4a   :  { %401 = vmatprep.subr.bf16.mxu0 %v550_v0  ;;  %376 = vmatprep.mubr.msk.f32.mxu0 %vm551_vm0, %v552_v1  ;;  %v82_v3 = vld [vmem:[#allocation5 + $0x8] sm:$0xff]  ;;  %v165_v5 = vld [vmem:[#allocation7] sm:$0xff]  ;;  %v166_v6 = vld [vmem:[#allocation7 + $0x8] sm:$0xff]  ;;  %vm90_vm1 = vcmask 130048   ;;  %vm176_vm2 = vcmask 261120   ;;  %s553_s28 = smov [#allocation10]  }
  0x4b   :  { %404 = vmatprep.subr.bf16.mxu1 %v550_v0  ;;  %387 = vmatprep.mubr.msk.f32.mxu1 %vm551_vm0, %v552_v1  ;;  %v402_v4 = vpack.c.bf16 %v82_v3, %v81_v2  ;;  %v405_v7 = vpack.c.bf16 %v166_v6, %v165_v5  ;;  %v80_v8 = vld [vmem:[#allocation2] sm:$0xff]  ;;  %v167_v9 = vld [vmem:[#allocation7 + $0x10] sm:$0xff]  ;;  %v168_v10 = vld [vmem:[#allocation7 + $0x18] sm:$0xff]  ;;  %s342_s29 = sshll.u32 %s553_s28, 4  ;;  %s343_s29 = int_to_ptr.vmem [resolvable:$true] %s342_s29 }
  0x4c   :  { %v408_v11 = vpack.c.bf16 %v168_v10, %v167_v9  ;;  %v251_v12 = vld [vmem:[#allocation8] sm:$0xff]  ;;  %v252_v13 = vld [vmem:[#allocation8 + $0x8] sm:$0xff]  ;;  %v253_v20 = vld [vmem:[#allocation8 + $0x10] sm:$0xff]  ;;  %s514_s30 = scalar_lea.vmem %s343_s29, 128  ;;  %p519_p5 = scmp.lt.s32.totalorder %s343_s29, %s343_s29 }
  0x4d   :  { %403 = vmatpush3.bf16.msra.mxu0 %v402_v4  ;;  %406 = vmatpush3.bf16.msra.mxu1 %v405_v7  ;;  %v411_v14 = vpack.c.bf16 %v252_v13, %v251_v12  ;;  %v353_v15 = vld [vmem:[%s677_s2] ss:$0 sm:$0xff]  ;;  %v254_v21 = vld [vmem:[#allocation8 + $0x18] sm:$0xff]  ;;  %p515_p4 = scmp.ne.s32.totalorder %s343_s29, %s514_s30  ;;  %p520_p6 = scmp.lt.s32.totalorder %s514_s30, %s514_s30 }
  0x4e   :  { %410 = vmatprep.subr.bf16.mxu0 %v550_v0  ;;  %407 = vmatprep.subr.bf16.mxu1 %v550_v0  ;;  %v414_v22 = vpack.c.bf16 %v254_v21, %v253_v20  ;;  %v355_v23 = vld [vmem:[%s679_s4] ss:$0 sm:$0xff] }
  0x4f   :  { %v357_v28 = vld [vmem:[%s681_s6] ss:$0 sm:$0xff]  ;;  %p521_p7 = por %p520_p6, %p519_p5 }
  0x50   :  { %377 = vmatmul.mubr.msk.f32.vlgmr.msra.gmra.mrb[0].mxu0 %vm90_vm1, %v80_v8 }
  0x51   :  { %398 = vmatprep.mubr.msk.f32.mxu0 %vm551_vm0, %v552_v1  ;;  %409 = vmatpush3.bf16.msra.mxu1 %v408_v11  ;;  %p522_p8 = pnand %p521_p7, %p515_p4 }
  0x52   :  { %412 = vmatpush3.bf16.msra.mxu0 %v411_v14 }
  0x53   :  { %413 = vmatprep.subr.bf16.mxu0 %v550_v0 }
  0x56   :  { %415 = vmatpush3.bf16.msra.mxu0 %v414_v22 }
 0x123   :  { %v160_v16 = vpop.f32.mrb[0].mxu0 }
 0x124   :  { %v161_v17 = vadd.f32 %v353_v15, %v160_v16  ;;  %v378_v18 = vpop.f32.mrb[1].mxu0 }
 0x126   :  { %v164_v19 = vmax.f32 %v161_v17, 0.0 }
 0x128   :  { %388 = vmatmul.mubr.msk.f32.vlgmr.msra.gmra.mrb[0].mxu1 %vm176_vm2, %v164_v19 }
 0x1fb   :  { %v246_v24 = vpop.f32.mrb[0].mxu1 }
 0x1fc   :  { %v247_v25 = vadd.f32 %v355_v23, %v246_v24  ;;  %v389_v26 = vpop.f32.mrb[1].mxu1 }
 0x1fe   :  { %v250_v27 = vmax.f32 %v247_v25, 0.0 }
 0x200   :  { %399 = vmatmul.mubr.msk.f32.vlgmr.msra.gmra.mrb[2].mxu0 %vm176_vm2, %v250_v27 }
 0x2d3   :  { %v331_v29 = vpop.f32.mrb[2].mxu0 }
 0x2d4   :  { %v332_v30 = vadd.f32 %v357_v28, %v331_v29  ;;  %v400_v31 = vpop.f32.mrb[3].mxu0 }
 0x2d6   :  { %335 = vst [vmem:[#allocation10] sm:$0xff] %v332_v30 }
 0x2d7   :  { %525 = shalt.err (!%p522_p8)
}
 0x2d8   :  { %s526_s9 = scalar_lea.hbm %s682_s7, 128 }
 0x2d9   :  { %p527_p9 = scmp.ne.s32.totalorder %s682_s7, %s526_s9  ;;  %p530_p10 = scmp.lt.u32.totalorder %s526_s9, %s682_s7 }
 0x2db   :  { %p532_p11 = pnand %p530_p10, %p527_p9 }
 0x2dd   :  { %535 = shalt.err (!%p532_p11)
}
 0x2de   :  { %345 = dma.vmem_to_hbm [thread:$0]  %s343_s29, 128, %s682_s7, [#allocation4]  }
 0x2df   :  { %542 = dma.done.wait [#allocation4], 128  }
 0x2e0   :  { %543 = vsyncadd [#allocation4], 4294967168 }
 0x2e1   :  { %349 = vsyncpa [#allocation3], 1 }
 0x2e2   :  { %350 = vsyncpa [#allocation6], 1 }
 0x2e3   :  { %351 = vsyncpa [#allocation9], 1 }
 0x2e4   :  { %352 = vsyncpa [#allocation4], 1 }

</bundles_post_ra>
